<compile_context>
chip_gen: v6e
topology: v6e:2x2x1
jax: 0.10.0
libtpu: 0.0.40
codegen_flags: <defaults>
</compile_context>

<pallas_src>
import math

import jax
import jax.numpy as jnp
from jax.experimental import pallas as pl
from jax.experimental.pallas import tpu as pltpu


def generator_kernel(z_ref, w1_ref, b1_ref, w2_ref, b2_ref, w3_ref, b3_ref,
                     out_ref):
    """Fused 3-layer MLP on one batch tile, batch on the lane axis.

    Shapes inside the kernel (TB = batch tile, H = nhidden):
      z_ref  : [2,  TB]        w1_ref : [H, 2]   b1_ref : [H, 1]
      w2_ref : [H, H]          b2_ref : [H, 1]
      w3_ref : [2, H]          b3_ref : [2, 1]
      out_ref: [2,  TB]
    """
    z = z_ref[...]                                  # [2, TB]
    w1 = w1_ref[...]                                # [H, 2]

    # ---- lin1 + relu : K=2 contraction -> two VPU outer-product FMAs ----
    h = (w1[:, 0:1] * z[0:1, :]                     # [H,1]*[1,TB] -> [H,TB]
         + w1[:, 1:2] * z[1:2, :]
         + b1_ref[...])                             # [H,1] broadcast over lanes
    h = jnp.maximum(h, 0.0)                         # [H, TB]

    # ---- lin2 + relu : HxH matmul on the MXU ----
    x2 = jnp.dot(w2_ref[...], h, preferred_element_type=jnp.float32)
    x2 = jnp.maximum(x2 + b2_ref[...], 0.0)         # [H, TB]

    # ---- lin3 : [2,H] @ [H,TB] -> lane-dense [2,TB] output ----
    x = jnp.dot(w3_ref[...], x2, preferred_element_type=jnp.float32)
    x = x + b3_ref[...]                             # [2, TB]

    out_ref[...] = x.astype(out_ref.dtype)


def generator_forward(z, params, *, batch_tile=128):
    """Run the fused Pallas kernel.

    z: [batch, 2] float32 (PyTorch convention)
    params: w1[H,2] b1[H,1] w2[H,H] b2[H,1] w3[2,H] b3[2,1]  (PyTorch [out,in])
    returns [batch, 2] float32
    """
    w1, b1 = params["w1"], params["b1"]
    w2, b2 = params["w2"], params["b2"]
    w3, b3 = params["w3"], params["b3"]

    batch = z.shape[0]
    in_dim = w1.shape[1]
    hidden = w2.shape[0]
    out_dim = w3.shape[0]

    # Lane-dense layout: batch goes on the last (lane) axis.
    z_t = z.T                                               # [2, batch]
    padded = pl.cdiv(batch, batch_tile) * batch_tile
    if padded != batch:
        z_t = jnp.pad(z_t, ((0, 0), (0, padded - batch)))

    grid = (padded // batch_tile,)

    def tile_spec(rows):
        # One batch tile per grid step; feature axis is full-extent.
        return pl.BlockSpec((rows, batch_tile), lambda i: (0, i))

    def resident_spec(shape):
        # Weights / biases: single full-extent block, resident across the grid.
        return pl.BlockSpec(shape, lambda i: (0, 0))

    weight_bytes = 4 * (w1.size + b1.size + w2.size + b2.size
                        + w3.size + b3.size)
    cost = pl.CostEstimate(
        flops=2 * padded * (in_dim * hidden + hidden * hidden
                            + hidden * out_dim),
        transcendentals=0,
        bytes_accessed=4 * padded * (in_dim + out_dim) + weight_bytes,
    )

    out_t = pl.pallas_call(
        generator_kernel,
        out_shape=jax.ShapeDtypeStruct((out_dim, padded), jnp.float32),
        grid=grid,
        in_specs=[
            tile_spec(in_dim),          # z tile   [2, TB]
            resident_spec(w1.shape),
            resident_spec(b1.shape),
            resident_spec(w2.shape),
            resident_spec(b2.shape),
            resident_spec(w3.shape),
            resident_spec(b3.shape),
        ],
        out_specs=tile_spec(out_dim),   # out tile [2, TB]
        compiler_params=pltpu.CompilerParams(
            dimension_semantics=("parallel",)),
        cost_estimate=cost,
    )(z_t, w1, b1, w2, b2, w3, b3)

    # Back to the PyTorch [batch, 2] convention; drop batch padding.
    return out_t[:, :batch].T


def init_generator_params(key, nhidden):
    """Deterministic init mirroring nn.Linear default (uniform +/- 1/sqrt(fan_in)).

    Weights kept in PyTorch layout [out, in]; biases as [out, 1] columns."""
    ks = jax.random.split(key, 6)

    def linear(kw, kb, fan_in, fan_out):
        bound = 1.0 / math.sqrt(fan_in)
        w = jax.random.uniform(kw, (fan_out, fan_in), jnp.float32,
                               minval=-bound, maxval=bound)
        b = jax.random.uniform(kb, (fan_out, 1), jnp.float32,
                               minval=-bound, maxval=bound)
        return w, b

    w1, b1 = linear(ks[0], ks[1], 2, nhidden)
    w2, b2 = linear(ks[2], ks[3], nhidden, nhidden)
    w3, b3 = linear(ks[4], ks[5], nhidden, 2)
    return {"w1": w1, "b1": b1, "w2": w2, "b2": b2, "w3": w3, "b3": b3}


def _reference(z, params):
    """Pure-JAX reference of the same forward pass ([batch, features] layout)."""
    h = jnp.maximum(z @ params["w1"].T + params["b1"].T, 0.0)
    x2 = jnp.maximum(h @ params["w2"].T + params["b2"].T, 0.0)
    return x2 @ params["w3"].T + params["b3"].T


if __name__ == "__main__":
    key = jax.random.PRNGKey(0)
    k_params, k_z1, k_z2 = jax.random.split(key, 3)

    nhidden = 32
    params = init_generator_params(k_params, nhidden)

    # Small shape consistent with the toy GAN (single batch tile, padded to 128).
    z_small = jax.random.normal(k_z1, (8, 2), jnp.float32)
    out_small = jax.block_until_ready(generator_forward(z_small, params))
    assert out_small.shape == (8, 2)
    assert jnp.allclose(out_small, _reference(z_small, params),
                        atol=1e-4, rtol=1e-4)

    # Larger batch exercising the multi-tile "parallel" grid path (3 tiles).
    z_big = jax.random.normal(k_z2, (384, 2), jnp.float32)
    out_big = jax.block_until_ready(generator_forward(z_big, params))
    assert out_big.shape == (384, 2)
    assert jnp.allclose(out_big, _reference(z_big, params),
                        atol=1e-4, rtol=1e-4)

    print("KERNEL_OK")
</pallas_src>

<mosaic_0001>
module attributes {stable_mosaic.version = 11 : i64} {
  func.func @generator_kernel(%arg0: i32, %arg1: memref<2x128xf32, #tpu.memory_space<vmem>>, %arg2: memref<32x2xf32, #tpu.memory_space<vmem>>, %arg3: memref<32x1xf32, #tpu.memory_space<vmem>>, %arg4: memref<32x32xf32, #tpu.memory_space<vmem>>, %arg5: memref<32x1xf32, #tpu.memory_space<vmem>>, %arg6: memref<2x32xf32, #tpu.memory_space<vmem>>, %arg7: memref<2x1xf32, #tpu.memory_space<vmem>>, %arg8: memref<2x128xf32, #tpu.memory_space<vmem>>) attributes {dimension_semantics = [#tpu.dimension_semantics<parallel>], iteration_bounds = array<i64: 1>, scalar_prefetch = 0 : i64, scratch_operands = 0 : i64, tpu.core_type = #tpu.core_type<tc>, window_params = [{transform_indices = @transform_0, window_bounds = array<i64: 2, 128>}, {pipeline_mode = #tpu.pipeline_mode<synchronous>, transform_indices = @transform_1, window_bounds = array<i64: 32, 2>}, {pipeline_mode = #tpu.pipeline_mode<synchronous>, transform_indices = @transform_2, window_bounds = array<i64: 32, 1>}, {pipeline_mode = #tpu.pipeline_mode<synchronous>, transform_indices = @transform_3, window_bounds = array<i64: 32, 32>}, {pipeline_mode = #tpu.pipeline_mode<synchronous>, transform_indices = @transform_4, window_bounds = array<i64: 32, 1>}, {pipeline_mode = #tpu.pipeline_mode<synchronous>, transform_indices = @transform_5, window_bounds = array<i64: 2, 32>}, {pipeline_mode = #tpu.pipeline_mode<synchronous>, transform_indices = @transform_6, window_bounds = array<i64: 2, 1>}, {transform_indices = @transform_7, window_bounds = array<i64: 2, 128>}]} {
    %c0 = arith.constant 0 : index
    %c0_0 = arith.constant 0 : index
    %0 = vector.load %arg1[%c0, %c0_0] : memref<2x128xf32, #tpu.memory_space<vmem>>, vector<2x128xf32>
    %c0_1 = arith.constant 0 : index
    %c0_2 = arith.constant 0 : index
    %1 = vector.load %arg2[%c0_1, %c0_2] : memref<32x2xf32, #tpu.memory_space<vmem>>, vector<32x2xf32>
    %2 = vector.extract_strided_slice %1 {offsets = [0, 0], sizes = [32, 1], strides = [1, 1]} : vector<32x2xf32> to vector<32x1xf32>
    %3 = vector.extract_strided_slice %0 {offsets = [0, 0], sizes = [1, 128], strides = [1, 1]} : vector<2x128xf32> to vector<1x128xf32>
    %4 = vector.broadcast %2 : vector<32x1xf32> to vector<32x128xf32>
    %5 = vector.broadcast %3 : vector<1x128xf32> to vector<32x128xf32>
    %6 = arith.mulf %4, %5 : vector<32x128xf32>
    %7 = vector.extract_strided_slice %1 {offsets = [0, 1], sizes = [32, 1], strides = [1, 1]} : vector<32x2xf32> to vector<32x1xf32>
    %8 = vector.extract_strided_slice %0 {offsets = [1, 0], sizes = [1, 128], strides = [1, 1]} : vector<2x128xf32> to vector<1x128xf32>
    %9 = vector.broadcast %7 : vector<32x1xf32> to vector<32x128xf32>
    %10 = vector.broadcast %8 : vector<1x128xf32> to vector<32x128xf32>
    %11 = arith.mulf %9, %10 : vector<32x128xf32>
    %12 = arith.addf %6, %11 : vector<32x128xf32>
    %c0_3 = arith.constant 0 : index
    %c0_4 = arith.constant 0 : index
    %13 = vector.load %arg3[%c0_3, %c0_4] : memref<32x1xf32, #tpu.memory_space<vmem>>, vector<32x1xf32>
    %14 = vector.broadcast %13 : vector<32x1xf32> to vector<32x128xf32>
    %15 = arith.addf %12, %14 : vector<32x128xf32>
    %cst = arith.constant 0.000000e+00 : f32
    %16 = vector.broadcast %cst : f32 to vector<32x128xf32>
    %17 = arith.maximumf %15, %16 : vector<32x128xf32>
    %c0_5 = arith.constant 0 : index
    %c0_6 = arith.constant 0 : index
    %18 = vector.load %arg4[%c0_5, %c0_6] : memref<32x32xf32, #tpu.memory_space<vmem>>, vector<32x32xf32>
    %cst_7 = arith.constant dense<0.000000e+00> : vector<32x128xf32>
    %19 = tpu.matmul %18, %17, %cst_7 {dimension_numbers = #tpu.dot_dimension_numbers<[1], [0], [0], [1], [0, 0, 1, 1], [], []>} : vector<32x32xf32>, vector<32x128xf32>, vector<32x128xf32> -> vector<32x128xf32>
    %c0_8 = arith.constant 0 : index
    %c0_9 = arith.constant 0 : index
    %20 = vector.load %arg5[%c0_8, %c0_9] : memref<32x1xf32, #tpu.memory_space<vmem>>, vector<32x1xf32>
    %21 = vector.broadcast %20 : vector<32x1xf32> to vector<32x128xf32>
    %22 = arith.addf %19, %21 : vector<32x128xf32>
    %cst_10 = arith.constant 0.000000e+00 : f32
    %23 = vector.broadcast %cst_10 : f32 to vector<32x128xf32>
    %24 = arith.maximumf %22, %23 : vector<32x128xf32>
    %c0_11 = arith.constant 0 : index
    %c0_12 = arith.constant 0 : index
    %25 = vector.load %arg6[%c0_11, %c0_12] : memref<2x32xf32, #tpu.memory_space<vmem>>, vector<2x32xf32>
    %cst_13 = arith.constant dense<0.000000e+00> : vector<2x128xf32>
    %26 = tpu.matmul %25, %24, %cst_13 {dimension_numbers = #tpu.dot_dimension_numbers<[1], [0], [0], [1], [0, 0, 1, 1], [], []>} : vector<2x32xf32>, vector<32x128xf32>, vector<2x128xf32> -> vector<2x128xf32>
    %c0_14 = arith.constant 0 : index
    %c0_15 = arith.constant 0 : index
    %27 = vector.load %arg7[%c0_14, %c0_15] : memref<2x1xf32, #tpu.memory_space<vmem>>, vector<2x1xf32>
    %28 = vector.broadcast %27 : vector<2x1xf32> to vector<2x128xf32>
    %29 = arith.addf %26, %28 : vector<2x128xf32>
    %c0_16 = arith.constant 0 : index
    %c0_17 = arith.constant 0 : index
    %30 = vector.load %arg8[%c0_16, %c0_17] : memref<2x128xf32, #tpu.memory_space<vmem>>, vector<2x128xf32>
    tpu.vector_store %arg8[%c0_16, %c0_17], %29 {strides = array<i32>} : memref<2x128xf32, #tpu.memory_space<vmem>>, vector<2x128xf32>,
    return
  }
  func.func @transform_0(%arg0: i32) -> (i32, i32) {
    %c0_i32 = arith.constant 0 : i32
    %c0_i32_0 = arith.constant 0 : i32
    return %c0_i32, %arg0 : i32, i32
  }
  func.func @transform_1(%arg0: i32) -> (i32, i32) {
    %c0_i32 = arith.constant 0 : i32
    %c0_i32_0 = arith.constant 0 : i32
    %c0_i32_1 = arith.constant 0 : i32
    return %c0_i32, %c0_i32_0 : i32, i32
  }
  func.func @transform_2(%arg0: i32) -> (i32, i32) {
    %c0_i32 = arith.constant 0 : i32
    %c0_i32_0 = arith.constant 0 : i32
    %c0_i32_1 = arith.constant 0 : i32
    return %c0_i32, %c0_i32_0 : i32, i32
  }
  func.func @transform_3(%arg0: i32) -> (i32, i32) {
    %c0_i32 = arith.constant 0 : i32
    %c0_i32_0 = arith.constant 0 : i32
    %c0_i32_1 = arith.constant 0 : i32
    return %c0_i32, %c0_i32_0 : i32, i32
  }
  func.func @transform_4(%arg0: i32) -> (i32, i32) {
    %c0_i32 = arith.constant 0 : i32
    %c0_i32_0 = arith.constant 0 : i32
    %c0_i32_1 = arith.constant 0 : i32
    return %c0_i32, %c0_i32_0 : i32, i32
  }
  func.func @transform_5(%arg0: i32) -> (i32, i32) {
    %c0_i32 = arith.constant 0 : i32
    %c0_i32_0 = arith.constant 0 : i32
    %c0_i32_1 = arith.constant 0 : i32
    return %c0_i32, %c0_i32_0 : i32, i32
  }
  func.func @transform_6(%arg0: i32) -> (i32, i32) {
    %c0_i32 = arith.constant 0 : i32
    %c0_i32_0 = arith.constant 0 : i32
    %c0_i32_1 = arith.constant 0 : i32
    return %c0_i32, %c0_i32_0 : i32, i32
  }
  func.func @transform_7(%arg0: i32) -> (i32, i32) {
    %c0_i32 = arith.constant 0 : i32
    %c0_i32_0 = arith.constant 0 : i32
    return %c0_i32, %arg0 : i32, i32
  }
}

</mosaic_0001>

<bundles_post_ra>
// kernel: tpu_custom_call.1
= control target key start
LH: loop header
LB: loop body
LE: loop exit
PB: predicated region body
PF: predicated region fallthrough
CT: control target
= control target key end

     0   :  { %v422_v2 = vmov 1   ;;  %v423_v3 = vmov 0   ;;  %s532_s0 = inlined_call_operand.vmem [shape: f32[2,128], index: 0, kind: input, shape index: {}]   ;;  %s533_s1 = inlined_call_operand.vmem [shape: f32[32,2], index: 1, kind: input, shape index: {}]   ;;  %s534_s2 = inlined_call_operand.vmem [shape: f32[32,1], index: 2, kind: input, shape index: {}]   ;;  %s535_s3 = inlined_call_operand.vmem [shape: f32[32,32], index: 3, kind: input, shape index: {}]   ;;  %s536_s4 = inlined_call_operand.vmem [shape: f32[32,1], index: 4, kind: input, shape index: {}]   ;;  %s537_s5 = inlined_call_operand.vmem [shape: f32[2,32], index: 5, kind: input, shape index: {}]   ;;  %s538_s6 = inlined_call_operand.vmem [shape: f32[2,1], index: 6, kind: input, shape index: {}]   ;;  %s539_s7 = inlined_call_operand.hbm [shape: f32[2,128], index: 7, kind: output, shape index: {}]  }
   0x1   :  { %v31_v0 = vld [vmem:[%s533_s1 + $0x18] sm:$0xff]  ;;  %v30_v1 = vld [vmem:[%s533_s1 + $0x10] sm:$0xff]  ;;  %393 = vset.pattern.permute.xlu0 %v422_v2  ;;  %394 = vset.pattern.permute.xlu1 %v423_v3  ;;  %v29_v4 = vld [vmem:[%s533_s1 + $0x8] sm:$0xff] }
   0x2   :  { %73 = vperm.xlu0 %393, %v31_v0   ;;  %44 = vperm.xlu1 %394, %v30_v1  }
   0x3   :  { %12 = vsyncpa [#allocation3], 0  ;;  %v28_v5 = vld [vmem:[%s533_s1] sm:$0xff]  ;;  %v91_v6 = vld [vmem:[%s534_s2 + $0x18] sm:$0xff]  ;;  %vm148_vm0 = vcmask 261120   ;;  %v52_v16 = vlaneseq  ;;  %v424_v58 = vmov 0.0  }
   0x4   :  { %v89_v7 = vld [vmem:[%s534_s2 + $0x8] sm:$0xff]  ;;  %v127_v8 = vld [vmem:[%s536_s4 + $0x18] sm:$0xff]  ;;  %v90_v9 = vld [vmem:[%s534_s2 + $0x10] sm:$0xff]  ;;  %377 = vmatprep.subr.mxu1 %v424_v58  ;;  %vm425_vm1 = vmmov 0   ;;  %s426_s10 = smov [#allocation2]  }
   0x5   :  { %v125_v10 = vld [vmem:[%s536_s4 + $0x8] sm:$0xff]  ;;  %v88_v11 = vld [vmem:[%s534_s2] sm:$0xff]  ;;  %v126_v14 = vld [vmem:[%s536_s4 + $0x10] sm:$0xff]  ;;  %v53_v17 = vshrl.u32 %v52_v16, 7  ;;  %385 = vmatprep.mubr.msk.f32.mxu1 %vm425_vm1, %v424_v58  ;;  %s337_s11 = sshll.u32 %s426_s10, 4  ;;  %s338_s11 = int_to_ptr.vmem [resolvable:$true] %s337_s11 }
   0x6   :  { %395 = vset.pattern.permute.xlu1 %v422_v2  ;;  %65 = vperm.xlu0 %393, %v29_v4   ;;  %v251_v12 = vld [vmem:[%s538_s6] sm:$0x3]  ;;  %v121_v55 = vld [vmem:[%s535_s3 + $0x8] sm:$0xff]  ;;  %v122_v56 = vld [vmem:[%s535_s3 + $0x10] sm:$0xff]  ;;  %s400_s12 = scalar_lea.vmem %s338_s11, 32  ;;  %p405_p1 = scmp.lt.s32.totalorder %s338_s11, %s338_s11 }
   0x7   :  { %69 = vperm.xlu1 %395, %v30_v1   ;;  %v120_v13 = vld [vmem:[%s535_s3] sm:$0xff]  ;;  %v78_v20 = vsub.s32 1, %v53_v17  ;;  %v54_v21 = vsub.s32 0, %v53_v17  ;;  %v123_v57 = vld [vmem:[%s535_s3 + $0x18] sm:$0xff]  ;;  %p401_p0 = scmp.ne.s32.totalorder %s338_s11, %s400_s12  ;;  %p406_p2 = scmp.lt.s32.totalorder %s400_s12, %s400_s12 }
   0x8   :  { %371 = vmatprep.mubr.msk.f32.mxu0 %vm148_vm0, %v120_v13  ;;  %v124_v15 = vld [vmem:[%s536_s4] sm:$0xff] }
   0x9   :  { %v27_v23 = vld [vmem:[%s532_s0] sm:$0x3]  ;;  %p407_p3 = por %p406_p2, %p405_p1 }
   0xa   :  { %397 = vset.pattern.permute.xlu0 %v423_v3  ;;  %v79_v25 = vrot.slane %v27_v23, %v78_v20  ;;  %v55_v26 = vrot.slane %v27_v23, %v54_v21 }
   0xb   :  { %396 = vset.pattern.permute.xlu1 %v423_v3  ;;  %49 = vperm.xlu0 %397, %v31_v0   ;;  %p408_p4 = pnand %p407_p3, %p401_p0 }
   0xc   :  { %39 = vperm.xlu1 %396, %v29_v4  }
   0xf   :  { %34 = vperm.xlu0 %397, %v28_v5  }
  0x10   :  { %109 = vperm.xlu1 %396, %v91_v6  }
  0x13   :  { %99 = vperm.xlu0 %397, %v89_v7  }
  0x14   :  { %398 = vset.pattern.permute.xlu1 %v422_v2 }
  0x15   :  { %61 = vperm.xlu1 %398, %v28_v5  }
  0x17   :  { %145 = vperm.xlu0 %397, %v127_v8  }
  0x19   :  { %399 = vset.pattern.permute.xlu1 %v423_v3 }
  0x1a   :  { %104 = vperm.xlu1 %399, %v90_v9  }
  0x1b   :  { %135 = vperm.xlu0 %397, %v125_v10  }
  0x1e   :  { %94 = vperm.xlu1 %399, %v88_v11   ;;  %v250_v11 = vld [vmem:[%s537_s5] sm:$0x3] }
  0x1f   :  { %254 = vperm.xlu0 %397, %v251_v12  }
  0x22   :  { %140 = vperm.xlu1 %399, %v126_v14  }
  0x26   :  { %130 = vperm.xlu1 %399, %v124_v15  }
  0x7d   :  { %v45_v18 = vpop.permute.xlu1 %44  ;;  %v74_v19 = vpop.permute.xlu0 %73 }
  0x7e   :  { %v83_v27 = vmul.f32 %v79_v25, %v74_v19  ;;  %v58_v40 = vmul.f32 %v55_v26, %v45_v18 }
  0x81   :  { %v66_v22 = vpop.permute.xlu0 %65 }
  0x82   :  { %v70_v24 = vpop.permute.xlu1 %69  ;;  %v81_v37 = vmul.f32 %v79_v25, %v66_v22 }
  0x83   :  { %v82_v36 = vmul.f32 %v79_v25, %v70_v24 }
  0x85   :  { %v86_v45 = vadd.f32 %v82_v36, %v58_v40 }
  0x86   :  { %v50_v28 = vpop.permute.xlu0 %49 }
  0x87   :  { %v59_v29 = vmul.f32 %v55_v26, %v50_v28  ;;  %v40_v30 = vpop.permute.xlu1 %39 }
  0x88   :  { %v57_v38 = vmul.f32 %v55_v26, %v40_v30 }
  0x89   :  { %v87_v31 = vadd.f32 %v83_v27, %v59_v29 }
  0x8a   :  { %v35_v34 = vpop.permute.xlu0 %34  ;;  %v85_v43 = vadd.f32 %v81_v37, %v57_v38 }
  0x8b   :  { %v110_v32 = vpop.permute.xlu1 %109  ;;  %v56_v42 = vmul.f32 %v55_v26, %v35_v34 }
  0x8c   :  { %v115_v33 = vadd.f32 %v110_v32, %v87_v31 }
  0x8e   :  { %v119_v35 = vmax.f32 %v115_v33, 0.0  ;;  %v100_v41 = vpop.permute.xlu0 %99 }
  0x8f   :  { %v113_v47 = vadd.f32 %v100_v41, %v85_v43 }
  0x90   :  { %v62_v39 = vpop.permute.xlu1 %61  ;;  %363 = vmatprep.subr.mxu0 %v119_v35 }
  0x91   :  { %364 = vmatpush3.msra.mxu0 %v119_v35  ;;  %v80_v44 = vmul.f32 %v79_v25, %v62_v39  ;;  %v117_v52 = vmax.f32 %v113_v47, 0.0 }
  0x92   :  { %v146_v59 = vpop.permute.xlu0 %145 }
  0x93   :  { %v84_v50 = vadd.f32 %v80_v44, %v56_v42 }
  0x95   :  { %v105_v46 = vpop.permute.xlu1 %104 }
  0x96   :  { %v114_v48 = vadd.f32 %v105_v46, %v86_v45  ;;  %v136_v1 = vpop.permute.xlu0 %135 }
  0x98   :  { %v118_v49 = vmax.f32 %v114_v48, 0.0 }
  0x99   :  { %v95_v51 = vpop.permute.xlu1 %94 }
  0x9a   :  { %v112_v53 = vadd.f32 %v95_v51, %v84_v50  ;;  %365 = vmatprep.subr.mxu0 %v118_v49  ;;  %v255_v12 = vpop.permute.xlu0 %254 }
  0x9b   :  { %366 = vmatpush3.msra.mxu0 %v118_v49 }
  0x9c   :  { %v116_v54 = vmax.f32 %v112_v53, 0.0  ;;  %367 = vmatprep.subr.mxu0 %v117_v52 }
  0x9d   :  { %368 = vmatpush3.msra.mxu0 %v117_v52  ;;  %v141_v61 = vpop.permute.xlu1 %140 }
  0x9e   :  { %369 = vmatprep.subr.mxu0 %v116_v54 }
  0x9f   :  { %370 = vmatpush3.msra.mxu0 %v116_v54 }
  0xa0   :  { %372 = vmatmul.mubr.msk.f32.vlgmr.msra.gmra.mxu0 %vm148_vm0, %v121_v55 }
  0xa1   :  { %374 = vmatprep.mubr.msk.f32.mxu0 %vm148_vm0, %v122_v56  ;;  %v131_v6 = vpop.permute.xlu1 %130 }
  0xa4   :  { %375 = vmatmul.mubr.msk.f32.gmra.mxu0 %vm148_vm0, %v123_v57 }
 0x160   :  { %v373_v60 = vpop.f32.mrf.mxu0 }
 0x161   :  { %v233_v3 = vadd.f32 %v373_v60, %v136_v1 }
 0x162   :  { %v227_v62 = vpop.f32.mrf.mxu0 }
 0x163   :  { %v228_v7 = vadd.f32 %v227_v62, %v131_v6  ;;  %v247_v9 = vmax.f32 %v233_v3, 0.0 }
 0x164   :  { %v376_v63 = vpop.f32.mrf.mxu0 }
 0x165   :  { %v243_v0 = vadd.f32 %v376_v63, %v146_v59  ;;  %v246_v10 = vmax.f32 %v228_v7, 0.0 }
 0x166   :  { %v237_v2 = vpop.f32.mrf.mxu0 }
 0x167   :  { %v249_v4 = vmax.f32 %v243_v0, 0.0  ;;  %v238_v5 = vadd.f32 %v237_v2, %v141_v61 }
 0x169   :  { %v248_v8 = vmax.f32 %v238_v5, 0.0  ;;  %378 = vmatpush3.msra.mxu1 %v249_v4 }
 0x16a   :  { %379 = vmatprep.subr.mxu1 %v424_v58 }
 0x16b   :  { %380 = vmatpush3.msra.mxu1 %v248_v8 }
 0x16c   :  { %381 = vmatprep.subr.mxu1 %v424_v58 }
 0x16d   :  { %382 = vmatpush3.msra.mxu1 %v247_v9 }
 0x16e   :  { %383 = vmatprep.subr.mxu1 %v424_v58 }
 0x16f   :  { %384 = vmatpush3.msra.mxu1 %v246_v10 }
 0x170   :  { %386 = vmatmul.mubr.msk.f32.vlgmr.msra.gmra.mxu1 %vm148_vm0, %v250_v11 }
 0x230   :  { %v326_v13 = vpop.f32.mrf.mxu1 }
 0x231   :  { %v327_v14 = vadd.f32 %v326_v13, %v255_v12 }
 0x232   :  { %v387_v15 = vpop.f32.mrf.mxu1 }
 0x233   :  { %330 = vst [vmem:[#allocation2] sm:$0x3] %v327_v14 }
 0x234   :  { %411 = shalt.err (!%p408_p4)
}
 0x235   :  { %340 = dma.vmem_to_hbm [thread:$0]  %s338_s11, 32, %s539_s7, [#allocation3]  }
 0x236   :  { %420 = dma.done.wait [#allocation3], 32  }
 0x237   :  { %421 = vsyncadd [#allocation3], 4294967264 }
 0x238   :  { %344 = vsyncpa [#allocation3], 1 }

</bundles_post_ra>
